<compile_context>
chip_gen: v6e
topology: v6e:2x2x1
jax: 0.10.0
libtpu: 0.0.40
codegen_flags: <defaults>
</compile_context>

<pallas_src>
import functools

import jax
import jax.numpy as jnp
from jax import lax
from jax.experimental import pallas as pl
from jax.experimental.pallas import tpu as pltpu

K = 3      # conv kernel size (fixed by the module)
LANE = 128


def _round_up(v, m):
    return ((v + m - 1) // m) * m


def _conv_kernel(x_ref, w1_ref, b1_ref, w2_ref, b2_ref, o_ref):
    """One grid step processes `nb` images.

    x_ref : (nb, H, W*Cin)   matmul dtype (bf16 or f32); lane idx = w*Cin + c
    w1_ref: (K,  W*Cin, P1)  banded conv1 weights, last dim zero-padded to P1
    b1_ref: (1, P1)          f32 bias row (padded lanes are 0)
    w2_ref: (K,  P1, P2)     banded conv2 weights (padded rows/cols are 0)
    b2_ref: (1, P2)          f32 bias row (padded lanes are 0)
    o_ref : (nb, H2, P2)     f32 lane-dense output slab (padded lanes end up 0)
    """
    nb = x_ref.shape[0]
    h = x_ref.shape[1]
    h1 = h - (K - 1)
    h2 = h1 - (K - 1)
    p1 = w1_ref.shape[2]
    p2 = w2_ref.shape[2]
    mm_dtype = w2_ref.dtype

    for n in range(nb):  # static unroll; nb is 1 (v7x) or N (v5e/v6e)
        # ---- conv1: K whole-image matmuls, Cin folded into the contraction ----
        acc1 = jnp.zeros((h1, p1), jnp.float32)
        for ky in range(K):
            acc1 = acc1 + jnp.dot(
                x_ref[n, ky:ky + h1, :],          # (H1, W*Cin) static slice
                w1_ref[ky],                       # (W*Cin, P1)
                preferred_element_type=jnp.float32)
        # bias + ReLU in f32 (v5e VPU has no bf16); only matmul operands are cast.
        h1_act = jnp.maximum(acc1 + b1_ref[...], 0.0).astype(mm_dtype)

        # ---- conv2: K matmuls on the lane-dense (H1, P1) intermediate ----
        acc2 = jnp.zeros((h2, p2), jnp.float32)
        for ky in range(K):
            acc2 = acc2 + jnp.dot(
                h1_act[ky:ky + h2, :],            # (H2, P1)
                w2_ref[ky],                       # (P1, P2)
                preferred_element_type=jnp.float32)
        # one unmasked, 128-lane-dense store per image
        o_ref[n] = jnp.maximum(acc2 + b2_ref[...], 0.0).astype(o_ref.dtype)


def _shift_selector(n_in, n_out):
    """S[kx, i, w] = 1.0 iff i == w + kx (maps input column i to output column w)."""
    kx = jnp.arange(K)[:, None, None]
    i = jnp.arange(n_in)[None, :, None]
    w = jnp.arange(n_out)[None, None, :]
    return (i == w + kx).astype(jnp.float32)


def pack_convolution_params(w1_oihw, b1, w2_oihw, b2, H, W, mm_dtype=jnp.bfloat16):
    """Build block-banded weight slabs + lane-replicated bias rows.

    Call ONCE per weight update (hoisted out of the hot forward path: the packing
    einsums + the ~60x weight inflation cost as much as the kernel at these shapes).
    """
    del H  # banding only depends on W
    cout, cin = w1_oihw.shape[0], w1_oihw.shape[1]
    w1d = W - (K - 1)                 # conv1 output width
    w2d = w1d - (K - 1)               # conv2 output width
    p1 = _round_up(w1d * cout, LANE)  # 112 -> 128
    p2 = _round_up(w2d * cout, LANE)  # 96  -> 128

    s1 = _shift_selector(W, w1d)      # (K, W,  W1)
    s2 = _shift_selector(w1d, w2d)    # (K, W1, W2)

    w1_t = jnp.transpose(w1_oihw, (1, 2, 3, 0)).astype(jnp.float32)  # (Cin, ky, kx, Cout)
    w2_t = jnp.transpose(w2_oihw, (1, 2, 3, 0)).astype(jnp.float32)  # (Cout, ky, kx, Cout)

    # W1b[ky, i*Cin+c,  w*Cout+o] = w1[o, c, ky, i-w]  (0 outside the band)
    w1b = jnp.einsum('xiw,cyxo->yicwo', s1, w1_t).reshape(K, W * cin, w1d * cout)
    # W2b[ky, i*Cout+c, w*Cout+o] = w2[o, c, ky, i-w]  (matches h1's w*Cout+c lanes)
    w2b = jnp.einsum('xiw,cyxo->yicwo', s2, w2_t).reshape(K, w1d * cout, w2d * cout)

    # Zero-pad to full 128-lane slabs: padded w1b columns keep h1's padded lanes at 0
    # (ReLU(0+0)=0); padded w2b rows/cols keep them out of conv2 and the output.
    w1b = jnp.pad(w1b, ((0, 0), (0, 0), (0, p1 - w1d * cout))).astype(mm_dtype)
    w2b = jnp.pad(w2b, ((0, 0), (0, p1 - w1d * cout),
                        (0, p2 - w2d * cout))).astype(mm_dtype)

    b1r = jnp.pad(jnp.tile(b1.astype(jnp.float32), w1d), (0, p1 - w1d * cout))[None, :]
    b2r = jnp.pad(jnp.tile(b2.astype(jnp.float32), w2d), (0, p2 - w2d * cout))[None, :]
    return w1b, b1r, w2b, b2r


def default_images_per_step(batch):
    """v7x (2 TensorCores/chip): one image per grid step so the 'parallel' grid axis
    shards across TCs.  Single-TC chips (v2..v6e): fold the whole batch into one grid
    step — each extra grid step costs ~0.35us, comparable to the whole compute here."""
    try:
        kind = jax.devices()[0].device_kind.lower()
        if "v7" in kind or "7x" in kind:
            return 1
    except Exception:
        pass
    return batch


@functools.partial(jax.jit, static_argnames=("out_c", "images_per_step"))
def convolution_forward(x_nchw, w1b, b1r, w2b, b2r, *, out_c, images_per_step=1):
    """Pallas forward of the PyTorch `Convolution` module.

    x_nchw: (N, Cin, H, W) float32.  Returns (N, out_c, H-4, W-4) in NCHW.
    The banded weights (w1b, b1r, w2b, b2r) come from `pack_convolution_params`.
    """
    N, Cin, H, W = x_nchw.shape
    assert N % images_per_step == 0
    H2 = H - 2 * (K - 1)
    W2 = W - 2 * (K - 1)
    P1 = w1b.shape[2]
    P2 = w2b.shape[2]
    nb = images_per_step

    # NCHW -> (N, H, W*Cin): fold Cin into the matmul contraction (lane = w*Cin + c).
    x = jnp.transpose(x_nchw, (0, 2, 3, 1)).reshape(N, H, W * Cin).astype(w1b.dtype)

    grid_spec = pltpu.PrefetchScalarGridSpec(
        num_scalar_prefetch=0,
        grid=(N // nb,),
        in_specs=[
            pl.BlockSpec((nb, H, W * Cin), lambda n: (n, 0, 0)),
            pl.BlockSpec((K, W * Cin, P1), lambda n: (0, 0, 0)),
            pl.BlockSpec((1, P1), lambda n: (0, 0)),
            pl.BlockSpec((K, P1, P2), lambda n: (0, 0, 0)),
            pl.BlockSpec((1, P2), lambda n: (0, 0)),
        ],
        out_specs=pl.BlockSpec((nb, H2, P2), lambda n: (n, 0, 0)),
    )

    out = pl.pallas_call(
        _conv_kernel,
        out_shape=jax.ShapeDtypeStruct((N, H2, P2), jnp.float32),
        grid_spec=grid_spec,
        compiler_params=pltpu.CompilerParams(
            dimension_semantics=("parallel",)),
    )(x, w1b, b1r, w2b, b2r)

    # Slice off the lane padding and restore the module's NCHW contract.
    out = out[:, :, :W2 * out_c].reshape(N, H2, W2, out_c)
    return jnp.transpose(out, (0, 3, 1, 2))


def _reference(x_nchw, w1_oihw, b1, w2_oihw, b2):
    """Pure-JAX reference of the PyTorch forward (NCHW, f32)."""
    dn = ("NCHW", "OIHW", "NCHW")
    c1 = lax.conv_general_dilated(x_nchw, w1_oihw, (1, 1), "VALID",
                                  dimension_numbers=dn) + b1[None, :, None, None]
    c1 = jnp.maximum(c1, 0.0)
    c2 = lax.conv_general_dilated(c1, w2_oihw, (1, 1), "VALID",
                                  dimension_numbers=dn) + b2[None, :, None, None]
    return jnp.maximum(c2, 0.0)


if __name__ == "__main__":
    # Small shapes consistent with the module: batch=2, in_c=4, out_c=8, 16x16.
    N, in_c, out_c, H, W = 2, 4, 8, 16, 16

    key = jax.random.PRNGKey(0)
    kx, kw1, kb1, kw2, kb2 = jax.random.split(key, 5)

    x = jax.random.normal(kx, (N, in_c, H, W), jnp.float32)

    # Deterministic PyTorch-style Conv2d init (uniform(-1/sqrt(fan_in), +...)).
    bound1 = 1.0 / (in_c * K * K) ** 0.5
    w1 = jax.random.uniform(kw1, (out_c, in_c, K, K), jnp.float32, -bound1, bound1)
    b1 = jax.random.uniform(kb1, (out_c,), jnp.float32, -bound1, bound1)
    bound2 = 1.0 / (out_c * K * K) ** 0.5
    w2 = jax.random.uniform(kw2, (out_c, out_c, K, K), jnp.float32, -bound2, bound2)
    b2 = jax.random.uniform(kb2, (out_c,), jnp.float32, -bound2, bound2)

    ref = _reference(x, w1, b1, w2, b2)
    nb = default_images_per_step(N)

    # (a) f32 matmul operands: tight check of the banded packing + kernel logic.
    packed_f32 = pack_convolution_params(w1, b1, w2, b2, H, W, mm_dtype=jnp.float32)
    out_f32 = convolution_forward(x, *packed_f32, out_c=out_c, images_per_step=nb)
    jax.block_until_ready(out_f32)
    assert out_f32.shape == (N, out_c, H - 4, W - 4), out_f32.shape
    assert jnp.allclose(out_f32, ref, atol=1e-5, rtol=1e-5), "f32 conv mismatch"

    # (b) bf16 matmul operands (MXU-native on v5e/v6e/v7x), f32 accumulate/elementwise.
    packed_bf16 = pack_convolution_params(w1, b1, w2, b2, H, W, mm_dtype=jnp.bfloat16)
    out_bf16 = convolution_forward(x, *packed_bf16, out_c=out_c, images_per_step=nb)
    jax.block_until_ready(out_bf16)
    assert out_bf16.shape == (N, out_c, H - 4, W - 4), out_bf16.shape
    assert jnp.allclose(out_bf16, ref, atol=3e-2, rtol=3e-2), "bf16 conv mismatch"

    print("KERNEL_OK")
</pallas_src>

<mosaic_0001>
module attributes {stable_mosaic.version = 11 : i64} {
  func.func @_conv_kernel(%arg0: i32, %arg1: memref<2x16x64xf32, #tpu.memory_space<vmem>>, %arg2: memref<3x64x128xf32, #tpu.memory_space<vmem>>, %arg3: memref<1x128xf32, #tpu.memory_space<vmem>>, %arg4: memref<3x128x128xf32, #tpu.memory_space<vmem>>, %arg5: memref<1x128xf32, #tpu.memory_space<vmem>>, %arg6: memref<2x12x128xf32, #tpu.memory_space<vmem>>) attributes {dimension_semantics = [#tpu.dimension_semantics<parallel>], iteration_bounds = array<i64: 1>, scalar_prefetch = 0 : i64, scratch_operands = 0 : i64, tpu.core_type = #tpu.core_type<tc>, window_params = [{transform_indices = @transform_0, window_bounds = array<i64: 2, 16, 64>}, {pipeline_mode = #tpu.pipeline_mode<synchronous>, transform_indices = @transform_1, window_bounds = array<i64: 3, 64, 128>}, {pipeline_mode = #tpu.pipeline_mode<synchronous>, transform_indices = @transform_2, window_bounds = array<i64: 1, 128>}, {pipeline_mode = #tpu.pipeline_mode<synchronous>, transform_indices = @transform_3, window_bounds = array<i64: 3, 128, 128>}, {pipeline_mode = #tpu.pipeline_mode<synchronous>, transform_indices = @transform_4, window_bounds = array<i64: 1, 128>}, {transform_indices = @transform_5, window_bounds = array<i64: 2, 12, 128>}]} {
    %cst = arith.constant 0.000000e+00 : f32
    %0 = vector.broadcast %cst : f32 to vector<14x128xf32>
    %c0 = arith.constant 0 : index
    %c0_0 = arith.constant 0 : index
    %c0_1 = arith.constant 0 : index
    %1 = vector.load %arg1[%c0, %c0_0, %c0_1] : memref<2x16x64xf32, #tpu.memory_space<vmem>>, vector<1x14x64xf32>
    %2 = vector.shape_cast %1 : vector<1x14x64xf32> to vector<14x64xf32>
    %c0_2 = arith.constant 0 : index
    %c0_3 = arith.constant 0 : index
    %c0_4 = arith.constant 0 : index
    %3 = vector.load %arg2[%c0_2, %c0_3, %c0_4] : memref<3x64x128xf32, #tpu.memory_space<vmem>>, vector<1x64x128xf32>
    %4 = vector.shape_cast %3 : vector<1x64x128xf32> to vector<64x128xf32>
    %cst_5 = arith.constant dense<0.000000e+00> : vector<14x128xf32>
    %5 = tpu.matmul %2, %4, %cst_5 {dimension_numbers = #tpu.dot_dimension_numbers<[1], [0], [0], [1], [0, 0, 1, 1], [], []>} : vector<14x64xf32>, vector<64x128xf32>, vector<14x128xf32> -> vector<14x128xf32>
    %6 = arith.addf %0, %5 : vector<14x128xf32>
    %c0_6 = arith.constant 0 : index
    %c1 = arith.constant 1 : index
    %c0_7 = arith.constant 0 : index
    %7 = vector.load %arg1[%c0_6, %c1, %c0_7] : memref<2x16x64xf32, #tpu.memory_space<vmem>>, vector<1x14x64xf32>
    %8 = vector.shape_cast %7 : vector<1x14x64xf32> to vector<14x64xf32>
    %c1_8 = arith.constant 1 : index
    %c0_9 = arith.constant 0 : index
    %c0_10 = arith.constant 0 : index
    %9 = vector.load %arg2[%c1_8, %c0_9, %c0_10] : memref<3x64x128xf32, #tpu.memory_space<vmem>>, vector<1x64x128xf32>
    %10 = vector.shape_cast %9 : vector<1x64x128xf32> to vector<64x128xf32>
    %cst_11 = arith.constant dense<0.000000e+00> : vector<14x128xf32>
    %11 = tpu.matmul %8, %10, %cst_11 {dimension_numbers = #tpu.dot_dimension_numbers<[1], [0], [0], [1], [0, 0, 1, 1], [], []>} : vector<14x64xf32>, vector<64x128xf32>, vector<14x128xf32> -> vector<14x128xf32>
    %12 = arith.addf %6, %11 : vector<14x128xf32>
    %c0_12 = arith.constant 0 : index
    %c2 = arith.constant 2 : index
    %c0_13 = arith.constant 0 : index
    %13 = vector.load %arg1[%c0_12, %c2, %c0_13] : memref<2x16x64xf32, #tpu.memory_space<vmem>>, vector<1x14x64xf32>
    %14 = vector.shape_cast %13 : vector<1x14x64xf32> to vector<14x64xf32>
    %c2_14 = arith.constant 2 : index
    %c0_15 = arith.constant 0 : index
    %c0_16 = arith.constant 0 : index
    %15 = vector.load %arg2[%c2_14, %c0_15, %c0_16] : memref<3x64x128xf32, #tpu.memory_space<vmem>>, vector<1x64x128xf32>
    %16 = vector.shape_cast %15 : vector<1x64x128xf32> to vector<64x128xf32>
    %cst_17 = arith.constant dense<0.000000e+00> : vector<14x128xf32>
    %17 = tpu.matmul %14, %16, %cst_17 {dimension_numbers = #tpu.dot_dimension_numbers<[1], [0], [0], [1], [0, 0, 1, 1], [], []>} : vector<14x64xf32>, vector<64x128xf32>, vector<14x128xf32> -> vector<14x128xf32>
    %18 = arith.addf %12, %17 : vector<14x128xf32>
    %c0_18 = arith.constant 0 : index
    %c0_19 = arith.constant 0 : index
    %19 = vector.load %arg3[%c0_18, %c0_19] : memref<1x128xf32, #tpu.memory_space<vmem>>, vector<1x128xf32>
    %20 = vector.broadcast %19 : vector<1x128xf32> to vector<14x128xf32>
    %21 = arith.addf %18, %20 : vector<14x128xf32>
    %cst_20 = arith.constant 0.000000e+00 : f32
    %22 = vector.broadcast %cst_20 : f32 to vector<14x128xf32>
    %23 = arith.maximumf %21, %22 : vector<14x128xf32>
    %cst_21 = arith.constant 0.000000e+00 : f32
    %24 = vector.broadcast %cst_21 : f32 to vector<12x128xf32>
    %25 = vector.extract_strided_slice %23 {offsets = [0, 0], sizes = [12, 128], strides = [1, 1]} : vector<14x128xf32> to vector<12x128xf32>
    %c0_22 = arith.constant 0 : index
    %c0_23 = arith.constant 0 : index
    %c0_24 = arith.constant 0 : index
    %26 = vector.load %arg4[%c0_22, %c0_23, %c0_24] : memref<3x128x128xf32, #tpu.memory_space<vmem>>, vector<1x128x128xf32>
    %27 = vector.shape_cast %26 : vector<1x128x128xf32> to vector<128x128xf32>
    %cst_25 = arith.constant dense<0.000000e+00> : vector<12x128xf32>
    %28 = tpu.matmul %25, %27, %cst_25 {dimension_numbers = #tpu.dot_dimension_numbers<[1], [0], [0], [1], [0, 0, 1, 1], [], []>} : vector<12x128xf32>, vector<128x128xf32>, vector<12x128xf32> -> vector<12x128xf32>
    %29 = arith.addf %24, %28 : vector<12x128xf32>
    %30 = vector.extract_strided_slice %23 {offsets = [1, 0], sizes = [12, 128], strides = [1, 1]} : vector<14x128xf32> to vector<12x128xf32>
    %c1_26 = arith.constant 1 : index
    %c0_27 = arith.constant 0 : index
    %c0_28 = arith.constant 0 : index
    %31 = vector.load %arg4[%c1_26, %c0_27, %c0_28] : memref<3x128x128xf32, #tpu.memory_space<vmem>>, vector<1x128x128xf32>
    %32 = vector.shape_cast %31 : vector<1x128x128xf32> to vector<128x128xf32>
    %cst_29 = arith.constant dense<0.000000e+00> : vector<12x128xf32>
    %33 = tpu.matmul %30, %32, %cst_29 {dimension_numbers = #tpu.dot_dimension_numbers<[1], [0], [0], [1], [0, 0, 1, 1], [], []>} : vector<12x128xf32>, vector<128x128xf32>, vector<12x128xf32> -> vector<12x128xf32>
    %34 = arith.addf %29, %33 : vector<12x128xf32>
    %35 = vector.extract_strided_slice %23 {offsets = [2, 0], sizes = [12, 128], strides = [1, 1]} : vector<14x128xf32> to vector<12x128xf32>
    %c2_30 = arith.constant 2 : index
    %c0_31 = arith.constant 0 : index
    %c0_32 = arith.constant 0 : index
    %36 = vector.load %arg4[%c2_30, %c0_31, %c0_32] : memref<3x128x128xf32, #tpu.memory_space<vmem>>, vector<1x128x128xf32>
    %37 = vector.shape_cast %36 : vector<1x128x128xf32> to vector<128x128xf32>
    %cst_33 = arith.constant dense<0.000000e+00> : vector<12x128xf32>
    %38 = tpu.matmul %35, %37, %cst_33 {dimension_numbers = #tpu.dot_dimension_numbers<[1], [0], [0], [1], [0, 0, 1, 1], [], []>} : vector<12x128xf32>, vector<128x128xf32>, vector<12x128xf32> -> vector<12x128xf32>
    %39 = arith.addf %34, %38 : vector<12x128xf32>
    %c0_34 = arith.constant 0 : index
    %c0_35 = arith.constant 0 : index
    %40 = vector.load %arg5[%c0_34, %c0_35] : memref<1x128xf32, #tpu.memory_space<vmem>>, vector<1x128xf32>
    %41 = vector.broadcast %40 : vector<1x128xf32> to vector<12x128xf32>
    %42 = arith.addf %39, %41 : vector<12x128xf32>
    %cst_36 = arith.constant 0.000000e+00 : f32
    %43 = vector.broadcast %cst_36 : f32 to vector<12x128xf32>
    %44 = arith.maximumf %42, %43 : vector<12x128xf32>
    %c0_37 = arith.constant 0 : index
    %c0_38 = arith.constant 0 : index
    %c0_39 = arith.constant 0 : index
    %45 = vector.load %arg6[%c0_37, %c0_38, %c0_39] : memref<2x12x128xf32, #tpu.memory_space<vmem>>, vector<1x12x128xf32>
    %46 = vector.shape_cast %45 : vector<1x12x128xf32> to vector<12x128xf32>
    %47 = vector.shape_cast %44 : vector<12x128xf32> to vector<1x12x128xf32>
    tpu.vector_store %arg6[%c0_37, %c0_38, %c0_39], %47 {strides = array<i32>} : memref<2x12x128xf32, #tpu.memory_space<vmem>>, vector<1x12x128xf32>,
    %cst_40 = arith.constant 0.000000e+00 : f32
    %48 = vector.broadcast %cst_40 : f32 to vector<14x128xf32>
    %c1_41 = arith.constant 1 : index
    %c0_42 = arith.constant 0 : index
    %c0_43 = arith.constant 0 : index
    %49 = vector.load %arg1[%c1_41, %c0_42, %c0_43] : memref<2x16x64xf32, #tpu.memory_space<vmem>>, vector<1x14x64xf32>
    %50 = vector.shape_cast %49 : vector<1x14x64xf32> to vector<14x64xf32>
    %c0_44 = arith.constant 0 : index
    %c0_45 = arith.constant 0 : index
    %c0_46 = arith.constant 0 : index
    %51 = vector.load %arg2[%c0_44, %c0_45, %c0_46] : memref<3x64x128xf32, #tpu.memory_space<vmem>>, vector<1x64x128xf32>
    %52 = vector.shape_cast %51 : vector<1x64x128xf32> to vector<64x128xf32>
    %cst_47 = arith.constant dense<0.000000e+00> : vector<14x128xf32>
    %53 = tpu.matmul %50, %52, %cst_47 {dimension_numbers = #tpu.dot_dimension_numbers<[1], [0], [0], [1], [0, 0, 1, 1], [], []>} : vector<14x64xf32>, vector<64x128xf32>, vector<14x128xf32> -> vector<14x128xf32>
    %54 = arith.addf %48, %53 : vector<14x128xf32>
    %c1_48 = arith.constant 1 : index
    %c1_49 = arith.constant 1 : index
    %c0_50 = arith.constant 0 : index
    %55 = vector.load %arg1[%c1_48, %c1_49, %c0_50] : memref<2x16x64xf32, #tpu.memory_space<vmem>>, vector<1x14x64xf32>
    %56 = vector.shape_cast %55 : vector<1x14x64xf32> to vector<14x64xf32>
    %c1_51 = arith.constant 1 : index
    %c0_52 = arith.constant 0 : index
    %c0_53 = arith.constant 0 : index
    %57 = vector.load %arg2[%c1_51, %c0_52, %c0_53] : memref<3x64x128xf32, #tpu.memory_space<vmem>>, vector<1x64x128xf32>
    %58 = vector.shape_cast %57 : vector<1x64x128xf32> to vector<64x128xf32>
    %cst_54 = arith.constant dense<0.000000e+00> : vector<14x128xf32>
    %59 = tpu.matmul %56, %58, %cst_54 {dimension_numbers = #tpu.dot_dimension_numbers<[1], [0], [0], [1], [0, 0, 1, 1], [], []>} : vector<14x64xf32>, vector<64x128xf32>, vector<14x128xf32> -> vector<14x128xf32>
    %60 = arith.addf %54, %59 : vector<14x128xf32>
    %c1_55 = arith.constant 1 : index
    %c2_56 = arith.constant 2 : index
    %c0_57 = arith.constant 0 : index
    %61 = vector.load %arg1[%c1_55, %c2_56, %c0_57] : memref<2x16x64xf32, #tpu.memory_space<vmem>>, vector<1x14x64xf32>
    %62 = vector.shape_cast %61 : vector<1x14x64xf32> to vector<14x64xf32>
    %c2_58 = arith.constant 2 : index
    %c0_59 = arith.constant 0 : index
    %c0_60 = arith.constant 0 : index
    %63 = vector.load %arg2[%c2_58, %c0_59, %c0_60] : memref<3x64x128xf32, #tpu.memory_space<vmem>>, vector<1x64x128xf32>
    %64 = vector.shape_cast %63 : vector<1x64x128xf32> to vector<64x128xf32>
    %cst_61 = arith.constant dense<0.000000e+00> : vector<14x128xf32>
    %65 = tpu.matmul %62, %64, %cst_61 {dimension_numbers = #tpu.dot_dimension_numbers<[1], [0], [0], [1], [0, 0, 1, 1], [], []>} : vector<14x64xf32>, vector<64x128xf32>, vector<14x128xf32> -> vector<14x128xf32>
    %66 = arith.addf %60, %65 : vector<14x128xf32>
    %c0_62 = arith.constant 0 : index
    %c0_63 = arith.constant 0 : index
    %67 = vector.load %arg3[%c0_62, %c0_63] : memref<1x128xf32, #tpu.memory_space<vmem>>, vector<1x128xf32>
    %68 = vector.broadcast %67 : vector<1x128xf32> to vector<14x128xf32>
    %69 = arith.addf %66, %68 : vector<14x128xf32>
    %cst_64 = arith.constant 0.000000e+00 : f32
    %70 = vector.broadcast %cst_64 : f32 to vector<14x128xf32>
    %71 = arith.maximumf %69, %70 : vector<14x128xf32>
    %cst_65 = arith.constant 0.000000e+00 : f32
    %72 = vector.broadcast %cst_65 : f32 to vector<12x128xf32>
    %73 = vector.extract_strided_slice %71 {offsets = [0, 0], sizes = [12, 128], strides = [1, 1]} : vector<14x128xf32> to vector<12x128xf32>
    %c0_66 = arith.constant 0 : index
    %c0_67 = arith.constant 0 : index
    %c0_68 = arith.constant 0 : index
    %74 = vector.load %arg4[%c0_66, %c0_67, %c0_68] : memref<3x128x128xf32, #tpu.memory_space<vmem>>, vector<1x128x128xf32>
    %75 = vector.shape_cast %74 : vector<1x128x128xf32> to vector<128x128xf32>
    %cst_69 = arith.constant dense<0.000000e+00> : vector<12x128xf32>
    %76 = tpu.matmul %73, %75, %cst_69 {dimension_numbers = #tpu.dot_dimension_numbers<[1], [0], [0], [1], [0, 0, 1, 1], [], []>} : vector<12x128xf32>, vector<128x128xf32>, vector<12x128xf32> -> vector<12x128xf32>
    %77 = arith.addf %72, %76 : vector<12x128xf32>
    %78 = vector.extract_strided_slice %71 {offsets = [1, 0], sizes = [12, 128], strides = [1, 1]} : vector<14x128xf32> to vector<12x128xf32>
    %c1_70 = arith.constant 1 : index
    %c0_71 = arith.constant 0 : index
    %c0_72 = arith.constant 0 : index
    %79 = vector.load %arg4[%c1_70, %c0_71, %c0_72] : memref<3x128x128xf32, #tpu.memory_space<vmem>>, vector<1x128x128xf32>
    %80 = vector.shape_cast %79 : vector<1x128x128xf32> to vector<128x128xf32>
    %cst_73 = arith.constant dense<0.000000e+00> : vector<12x128xf32>
    %81 = tpu.matmul %78, %80, %cst_73 {dimension_numbers = #tpu.dot_dimension_numbers<[1], [0], [0], [1], [0, 0, 1, 1], [], []>} : vector<12x128xf32>, vector<128x128xf32>, vector<12x128xf32> -> vector<12x128xf32>
    %82 = arith.addf %77, %81 : vector<12x128xf32>
    %83 = vector.extract_strided_slice %71 {offsets = [2, 0], sizes = [12, 128], strides = [1, 1]} : vector<14x128xf32> to vector<12x128xf32>
    %c2_74 = arith.constant 2 : index
    %c0_75 = arith.constant 0 : index
    %c0_76 = arith.constant 0 : index
    %84 = vector.load %arg4[%c2_74, %c0_75, %c0_76] : memref<3x128x128xf32, #tpu.memory_space<vmem>>, vector<1x128x128xf32>
    %85 = vector.shape_cast %84 : vector<1x128x128xf32> to vector<128x128xf32>
    %cst_77 = arith.constant dense<0.000000e+00> : vector<12x128xf32>
    %86 = tpu.matmul %83, %85, %cst_77 {dimension_numbers = #tpu.dot_dimension_numbers<[1], [0], [0], [1], [0, 0, 1, 1], [], []>} : vector<12x128xf32>, vector<128x128xf32>, vector<12x128xf32> -> vector<12x128xf32>
    %87 = arith.addf %82, %86 : vector<12x128xf32>
    %c0_78 = arith.constant 0 : index
    %c0_79 = arith.constant 0 : index
    %88 = vector.load %arg5[%c0_78, %c0_79] : memref<1x128xf32, #tpu.memory_space<vmem>>, vector<1x128xf32>
    %89 = vector.broadcast %88 : vector<1x128xf32> to vector<12x128xf32>
    %90 = arith.addf %87, %89 : vector<12x128xf32>
    %cst_80 = arith.constant 0.000000e+00 : f32
    %91 = vector.broadcast %cst_80 : f32 to vector<12x128xf32>
    %92 = arith.maximumf %90, %91 : vector<12x128xf32>
    %c1_81 = arith.constant 1 : index
    %c0_82 = arith.constant 0 : index
    %c0_83 = arith.constant 0 : index
    %93 = vector.load %arg6[%c1_81, %c0_82, %c0_83] : memref<2x12x128xf32, #tpu.memory_space<vmem>>, vector<1x12x128xf32>
    %94 = vector.shape_cast %93 : vector<1x12x128xf32> to vector<12x128xf32>
    %95 = vector.shape_cast %92 : vector<12x128xf32> to vector<1x12x128xf32>
    tpu.vector_store %arg6[%c1_81, %c0_82, %c0_83], %95 {strides = array<i32>} : memref<2x12x128xf32, #tpu.memory_space<vmem>>, vector<1x12x128xf32>,
    return
  }
  func.func @transform_0(%arg0: i32) -> (i32, i32, i32) {
    %c0_i32 = arith.constant 0 : i32
    %c0_i32_0 = arith.constant 0 : i32
    %c0_i32_1 = arith.constant 0 : i32
    return %arg0, %c0_i32, %c0_i32_0 : i32, i32, i32
  }
  func.func @transform_1(%arg0: i32) -> (i32, i32, i32) {
    %c0_i32 = arith.constant 0 : i32
    %c0_i32_0 = arith.constant 0 : i32
    %c0_i32_1 = arith.constant 0 : i32
    %c0_i32_2 = arith.constant 0 : i32
    return %c0_i32, %c0_i32_0, %c0_i32_1 : i32, i32, i32
  }
  func.func @transform_2(%arg0: i32) -> (i32, i32) {
    %c0_i32 = arith.constant 0 : i32
    %c0_i32_0 = arith.constant 0 : i32
    %c0_i32_1 = arith.constant 0 : i32
    return %c0_i32, %c0_i32_0 : i32, i32
  }
  func.func @transform_3(%arg0: i32) -> (i32, i32, i32) {
    %c0_i32 = arith.constant 0 : i32
    %c0_i32_0 = arith.constant 0 : i32
    %c0_i32_1 = arith.constant 0 : i32
    %c0_i32_2 = arith.constant 0 : i32
    return %c0_i32, %c0_i32_0, %c0_i32_1 : i32, i32, i32
  }
  func.func @transform_4(%arg0: i32) -> (i32, i32) {
    %c0_i32 = arith.constant 0 : i32
    %c0_i32_0 = arith.constant 0 : i32
    %c0_i32_1 = arith.constant 0 : i32
    return %c0_i32, %c0_i32_0 : i32, i32
  }
  func.func @transform_5(%arg0: i32) -> (i32, i32, i32) {
    %c0_i32 = arith.constant 0 : i32
    %c0_i32_0 = arith.constant 0 : i32
    %c0_i32_1 = arith.constant 0 : i32
    return %arg0, %c0_i32, %c0_i32_0 : i32, i32, i32
  }
}

</mosaic_0001>

<bundles_post_ra>
// kernel: convolution_forward.1
= control target key start
LH: loop header
LB: loop body
LE: loop exit
PB: predicated region body
PF: predicated region fallthrough
CT: control target
= control target key end

     0   :  { %10 = vsyncpa [#allocation3], 0  ;;  %s1825_s18 = smov [#allocation2]   ;;  %s2528_s0 = inlined_call_operand.vmem [shape: f32[2,16,64], index: 0, kind: input, shape index: {}]   ;;  %s2529_s1 = inlined_call_operand.hbm [shape: f32[3,64,128], index: 1, kind: input, shape index: {}]   ;;  %s2530_s2 = inlined_call_operand.vmem [shape: f32[1,128], index: 2, kind: input, shape index: {}]   ;;  %s2531_s3 = inlined_call_operand.vmem [shape: f32[3,128,128], index: 3, kind: input, shape index: {}]   ;;  %s2532_s4 = inlined_call_operand.vmem [shape: f32[1,128], index: 4, kind: input, shape index: {}]   ;;  %s2533_s5 = inlined_call_operand.vmem [shape: f32[2,12,128], index: 5, kind: output, shape index: {}]  }
   0x1   :  { %s18_s19 = sshll.u32 %s1825_s18, 4  ;;  %s19_s19 = int_to_ptr.vmem [resolvable:$true] %s18_s19 }
   0x2   :  { %s1811_s20 = scalar_lea.vmem %s19_s19, 3072  ;;  %p1816_p1 = scmp.lt.s32.totalorder %s19_s19, %s19_s19 }
   0x3   :  { %p1812_p0 = scmp.ne.s32.totalorder %s19_s19, %s1811_s20  ;;  %p1817_p2 = scmp.lt.s32.totalorder %s1811_s20, %s1811_s20 }
   0x5   :  { %p1818_p3 = por %p1817_p2, %p1816_p1 }
   0x7   :  { %p1819_p4 = pnand %p1818_p3, %p1812_p0 }
   0x9   :  { %1822 = shalt.err (!%p1819_p4)
}
   0xa   :  { %s1826_s21 = smov 128   ;;  %s1827_s22 = smov 8  }
   0xb   :  { %24 = dma.hbm_to_vmem [thread:$0]  %s2529_s1, 3072, %s19_s19, [#allocation3], %s1826_s21, %s1826_s21, %s1827_s22  }
   0xc   :  { %1823 = dma.done.wait [#allocation3], 3072  }
   0xd   :  { %1824 = vsyncadd [#allocation3], 4294964224  ;;  %v1861_v0 = vld [vmem:[#allocation2 + $0x78] sm:$0xff]  ;;  %v1863_v1 = vld [vmem:[#allocation2 + $0x70] sm:$0xff]  ;;  %vm55_vm0 = vcmask 523264   ;;  %vm358_vm1 = vcmask 1046528  }
   0xe   :  { %1476 = vmatprep.subr.mxu1 %v1861_v0  ;;  %v1867_v2 = vld [vmem:[#allocation2 + $0x68] sm:$0xff]  ;;  %v1874_v4 = vld [vmem:[#allocation2 + $0xb8] sm:$0xff]  ;;  %v1877_v5 = vld [vmem:[#allocation2 + $0x60] sm:$0xff]  ;;  %vm531_vm2 = vcmask 1045504  }
   0xf   :  { %1477 = vmatpush3.msra.mxu1 %v1861_v0  ;;  %v44_v3 = vld [vmem:[%s2528_s0 + $0x1] sm:$0xff]  ;;  %1514 = vmatprep.subr.mxu0 %v1874_v4  ;;  %v1880_v6 = vld [vmem:[#allocation2 + $0xb0] sm:$0xff]  ;;  %v1887_v8 = vld [vmem:[#allocation2 + $0x58] sm:$0xff] }
  0x10   :  { %1478 = vmatprep.subr.mxu1 %v1863_v1  ;;  %1492 = vmatprep.mubr.msk.f32.mxu1 %vm55_vm0, %v44_v3  ;;  %v1884_v7 = vld [vmem:[#allocation2 + $0xa8] sm:$0xff]  ;;  %v1892_v9 = vld [vmem:[#allocation2 + $0xa0] sm:$0xff]  ;;  %v1895_v10 = vld [vmem:[#allocation2 + $0x50] sm:$0xff] }
  0x11   :  { %1479 = vmatpush3.msra.mxu1 %v1863_v1  ;;  %1515 = vmatpush3.msra.mxu0 %v1874_v4  ;;  %v1900_v11 = vld [vmem:[#allocation2 + $0x98] sm:$0xff]  ;;  %v1903_v12 = vld [vmem:[#allocation2 + $0x48] sm:$0xff]  ;;  %v1908_v13 = vld [vmem:[#allocation2 + $0x90] sm:$0xff] }
  0x12   :  { %1480 = vmatprep.subr.mxu1 %v1867_v2  ;;  %1516 = vmatprep.subr.mxu0 %v1880_v6  ;;  %v1911_v14 = vld [vmem:[#allocation2 + $0x40] sm:$0xff]  ;;  %v1916_v15 = vld [vmem:[#allocation2 + $0x88] sm:$0xff]  ;;  %v1922_v17 = vld [vmem:[#allocation2 + $0x38] sm:$0xff] }
  0x13   :  { %1481 = vmatpush3.msra.mxu1 %v1867_v2  ;;  %1517 = vmatpush3.msra.mxu0 %v1880_v6  ;;  %v45_v16 = vld [vmem:[%s2528_s0 + $0x9] sm:$0x3f]  ;;  %v1928_v18 = vld [vmem:[#allocation2 + $0x30] sm:$0xff]  ;;  %v1931_v19 = vld [vmem:[#allocation2 + $0x80] sm:$0xff] }
  0x14   :  { %1482 = vmatprep.subr.mxu1 %v1877_v5  ;;  %1518 = vmatprep.subr.mxu0 %v1884_v7  ;;  %v34_v20 = vld [vmem:[%s2528_s0] sm:$0xff]  ;;  %v1939_v21 = vld [vmem:[#allocation2 + $0x28] sm:$0xff]  ;;  %v1959_v25 = vld [vmem:[%s2531_s3 + $0x78] sm:$0xff] }
  0x15   :  { %1483 = vmatpush3.msra.mxu1 %v1877_v5  ;;  %1519 = vmatpush3.msra.mxu0 %v1884_v7  ;;  %v218_v22 = vld [vmem:[%s2528_s0 + $0x2] sm:$0xff]  ;;  %v219_v24 = vld [vmem:[%s2528_s0 + $0xa] sm:$0x3f]  ;;  %v1962_v26 = vld [vmem:[#allocation2 + $0x18] sm:$0xff] }
  0x16   :  { %1484 = vmatprep.subr.mxu1 %v1887_v8  ;;  %1520 = vmatprep.subr.mxu0 %v1892_v9  ;;  %v1948_v23 = vld [vmem:[#allocation2 + $0x20] sm:$0xff]  ;;  %v1970_v27 = vld [vmem:[%s2531_s3 + $0x70] sm:$0xff]  ;;  %v1981_v29 = vld [vmem:[%s2531_s3 + $0x68] sm:$0xff] }
  0x17   :  { %1485 = vmatpush3.msra.mxu1 %v1887_v8  ;;  %1521 = vmatpush3.msra.mxu0 %v1892_v9  ;;  %v1973_v28 = vld [vmem:[#allocation2 + $0x10] sm:$0xff]  ;;  %v1984_v30 = vld [vmem:[#allocation2 + $0x8] sm:$0xff]  ;;  %v1990_v31 = vld [vmem:[#allocation2] sm:$0xff] }
  0x18   :  { %1486 = vmatprep.subr.mxu1 %v1895_v10  ;;  %1522 = vmatprep.subr.mxu0 %v1900_v11  ;;  %v35_v32 = vld [vmem:[%s2528_s0 + $0x8] sm:$0x3f]  ;;  %v2002_v33 = vld [vmem:[%s2531_s3 + $0xf8] sm:$0xff]  ;;  %v2012_v34 = vld [vmem:[%s2531_s3 + $0xf0] sm:$0xff] }
  0x19   :  { %1487 = vmatpush3.msra.mxu1 %v1895_v10  ;;  %1523 = vmatpush3.msra.mxu0 %v1900_v11  ;;  %v2018_v35 = vld [vmem:[%s2531_s3 + $0x60] sm:$0xff]  ;;  %v2025_v36 = vld [vmem:[%s2531_s3 + $0xe8] sm:$0xff]  ;;  %v2032_v37 = vld [vmem:[%s2531_s3 + $0x58] sm:$0xff] }
  0x1a   :  { %1488 = vmatprep.subr.mxu1 %v1903_v12  ;;  %1524 = vmatprep.subr.mxu0 %v1908_v13  ;;  %v2037_v38 = vld [vmem:[%s2531_s3 + $0xe0] sm:$0xff]  ;;  %v2042_v39 = vld [vmem:[%s2531_s3 + $0x50] sm:$0xff]  ;;  %v2049_v40 = vld [vmem:[%s2531_s3 + $0xd8] sm:$0xff] }
  0x1b   :  { %1489 = vmatpush3.msra.mxu1 %v1903_v12  ;;  %1525 = vmatpush3.msra.mxu0 %v1908_v13  ;;  %v2056_v41 = vld [vmem:[%s2531_s3 + $0x48] sm:$0xff]  ;;  %v2063_v42 = vld [vmem:[%s2531_s3 + $0xd0] sm:$0xff]  ;;  %v2070_v43 = vld [vmem:[%s2531_s3 + $0x40] sm:$0xff] }
  0x1c   :  { %1490 = vmatprep.subr.mxu1 %v1911_v14  ;;  %1526 = vmatprep.subr.mxu0 %v1916_v15  ;;  %v2077_v44 = vld [vmem:[%s2531_s3 + $0xc8] sm:$0xff]  ;;  %v2084_v45 = vld [vmem:[%s2531_s3 + $0x38] sm:$0xff]  ;;  %v2091_v46 = vld [vmem:[%s2531_s3 + $0xc0] sm:$0xff] }
  0x1d   :  { %1491 = vmatpush3.msra.mxu1 %v1911_v14  ;;  %1527 = vmatpush3.msra.mxu0 %v1916_v15  ;;  %2552 = vst [vmem:[#allocation5_spill] sm:$0xff] %v2084_v45  ;;  %v2098_v47 = vld [vmem:[%s2531_s3 + $0x30] sm:$0xff]  ;;  %v2105_v48 = vld [vmem:[%s2531_s3 + $0xb8] sm:$0xff]  ;;  %v2112_v49 = vld [vmem:[%s2531_s3 + $0x28] sm:$0xff] }
  0x1e   :  { %1493 = vmatmul.mubr.msk.f32.vlgmr.msra.gmra.mxu1 %vm55_vm0, %v45_v16  ;;  %1495 = vmatprep.subr.mxu1 %v1922_v17  ;;  %2553 = vst [vmem:[#allocation6_spill] sm:$0xff] %v2098_v47  ;;  %2554 = vst [vmem:[#allocation7_spill] sm:$0xff] %v2112_v49  ;;  %v2123_v50 = vld [vmem:[%s2531_s3 + $0xb0] sm:$0xff]  ;;  %v2130_v51 = vld [vmem:[%s2531_s3 + $0x20] sm:$0xff] }
  0x1f   :  { %1496 = vmatpush3.msra.mxu1 %v1922_v17  ;;  %1528 = vmatprep.subr.mxu0 %v1931_v19  ;;  %2555 = vst [vmem:[#allocation8_spill] sm:$0xff] %v2130_v51  ;;  %v2137_v52 = vld [vmem:[%s2531_s3 + $0xa8] sm:$0xff]  ;;  %v2144_v53 = vld [vmem:[%s2531_s3 + $0x18] sm:$0xff]  ;;  %v2151_v54 = vld [vmem:[%s2531_s3 + $0xa0] sm:$0xff] }
  0x20   :  { %1497 = vmatprep.subr.mxu1 %v1928_v18  ;;  %1511 = vmatprep.mubr.msk.f32.mxu1 %vm55_vm0, %v34_v20  ;;  %2556 = vst [vmem:[#allocation9_spill] sm:$0xff] %v2144_v53  ;;  %v2158_v55 = vld [vmem:[%s2531_s3 + $0x10] sm:$0xff]  ;;  %v2165_v56 = vld [vmem:[%s2531_s3 + $0x98] sm:$0xff]  ;;  %v2172_v57 = vld [vmem:[%s2531_s3 + $0x8] sm:$0xff] }
  0x21   :  { %1498 = vmatpush3.msra.mxu1 %v1928_v18  ;;  %1529 = vmatpush3.msra.mxu0 %v1931_v19  ;;  %2557 = vst [vmem:[#allocation10_spill] sm:$0xff] %v2158_v55  ;;  %2558 = vst [vmem:[#allocation11_spill] sm:$0xff] %v2172_v57  ;;  %v2179_v58 = vld [vmem:[%s2531_s3 + $0x90] sm:$0xff]  ;;  %v2186_v59 = vld [vmem:[%s2531_s3] sm:$0xff] }
  0x22   :  { %1499 = vmatprep.subr.mxu1 %v1939_v21  ;;  %1530 = vmatprep.mubr.msk.f32.mxu0 %vm55_vm0, %v218_v22  ;;  %2559 = vst [vmem:[#allocation12_spill] sm:$0xff] %v2186_v59  ;;  %v2193_v60 = vld [vmem:[%s2531_s3 + $0x88] sm:$0xff]  ;;  %v2202_v61 = vld [vmem:[%s2531_s3 + $0x80] sm:$0xff]  ;;  %v2209_v62 = vld [vmem:[%s2531_s3 + $0x178] sm:$0xff] }
  0x23   :  { %1500 = vmatpush3.msra.mxu1 %v1939_v21  ;;  %1531 = vmatmul.mubr.msk.f32.vlgmr.msra.gmra.mxu0 %vm55_vm0, %v219_v24  ;;  %2560 = vst [vmem:[#allocation13_spill] sm:$0xff] %v2202_v61  ;;  %v2215_v24 = vld [vmem:[%s2530_s2] ss:$0 sm:$0xff] }
  0x24   :  { %1501 = vmatprep.subr.mxu1 %v1948_v23  ;;  %1568 = vmatprep.subr.mxu0 %v1959_v25 }
  0x25   :  { %1502 = vmatpush3.msra.mxu1 %v1948_v23  ;;  %1569 = vmatpush3.msra.mxu0 %v1959_v25 }
  0x26   :  { %1503 = vmatprep.subr.mxu1 %v1962_v26  ;;  %1570 = vmatprep.subr.mxu0 %v1970_v27 }
  0x27   :  { %1504 = vmatpush3.msra.mxu1 %v1962_v26  ;;  %1571 = vmatpush3.msra.mxu0 %v1970_v27 }
  0x28   :  { %1505 = vmatprep.subr.mxu1 %v1973_v28  ;;  %1572 = vmatprep.subr.mxu0 %v1981_v29 }
  0x29   :  { %1506 = vmatpush3.msra.mxu1 %v1973_v28  ;;  %1573 = vmatpush3.msra.mxu0 %v1981_v29 }
  0x2a   :  { %1507 = vmatprep.subr.mxu1 %v1984_v30  ;;  %1574 = vmatprep.subr.mxu0 %v2018_v35 }
  0x2b   :  { %1508 = vmatpush3.msra.mxu1 %v1984_v30  ;;  %1575 = vmatpush3.msra.mxu0 %v2018_v35 }
  0x2c   :  { %1509 = vmatprep.subr.mxu1 %v1990_v31  ;;  %1576 = vmatprep.subr.mxu0 %v2032_v37 }
  0x2d   :  { %1510 = vmatpush3.msra.mxu1 %v1990_v31  ;;  %1577 = vmatpush3.msra.mxu0 %v2032_v37 }
  0x2e   :  { %1512 = vmatmul.mubr.msk.f32.vlgmr.msra.gmra.mxu1 %vm55_vm0, %v35_v32  ;;  %1533 = vmatprep.subr.mxu1 %v2002_v33 }
  0x2f   :  { %1534 = vmatpush3.msra.mxu1 %v2002_v33  ;;  %1578 = vmatprep.subr.mxu0 %v2042_v39 }
  0x30   :  { %1535 = vmatprep.subr.mxu1 %v2012_v34  ;;  %1579 = vmatpush3.msra.mxu0 %v2042_v39 }
  0x31   :  { %1536 = vmatpush3.msra.mxu1 %v2012_v34  ;;  %1580 = vmatprep.subr.mxu0 %v2056_v41 }
  0x32   :  { %1537 = vmatprep.subr.mxu1 %v2025_v36  ;;  %1581 = vmatpush3.msra.mxu0 %v2056_v41 }
  0x33   :  { %1538 = vmatpush3.msra.mxu1 %v2025_v36  ;;  %1582 = vmatprep.subr.mxu0 %v2070_v43 }
  0x34   :  { %1539 = vmatprep.subr.mxu1 %v2037_v38  ;;  %1583 = vmatpush3.msra.mxu0 %v2070_v43 }
  0x35   :  { %1540 = vmatpush3.msra.mxu1 %v2037_v38  ;;  %1584 = vmatprep.subr.mxu0 %v2084_v45 }
  0x36   :  { %1541 = vmatprep.subr.mxu1 %v2049_v40  ;;  %1585 = vmatpush3.msra.mxu0 %v2084_v45 }
  0x37   :  { %1542 = vmatpush3.msra.mxu1 %v2049_v40  ;;  %1586 = vmatprep.subr.mxu0 %v2098_v47 }
  0x38   :  { %1543 = vmatprep.subr.mxu1 %v2063_v42  ;;  %1587 = vmatpush3.msra.mxu0 %v2098_v47 }
  0x39   :  { %1544 = vmatpush3.msra.mxu1 %v2063_v42  ;;  %1588 = vmatprep.subr.mxu0 %v2112_v49 }
  0x3a   :  { %1545 = vmatprep.subr.mxu1 %v2077_v44  ;;  %1589 = vmatpush3.msra.mxu0 %v2112_v49 }
  0x3b   :  { %1546 = vmatpush3.msra.mxu1 %v2077_v44  ;;  %1590 = vmatprep.subr.mxu0 %v2130_v51 }
  0x3c   :  { %1547 = vmatprep.subr.mxu1 %v2091_v46  ;;  %1591 = vmatpush3.msra.mxu0 %v2130_v51 }
  0x3d   :  { %1548 = vmatpush3.msra.mxu1 %v2091_v46  ;;  %1592 = vmatprep.subr.mxu0 %v2144_v53 }
  0x3e   :  { %1549 = vmatprep.subr.mxu1 %v2105_v48  ;;  %1593 = vmatpush3.msra.mxu0 %v2144_v53 }
  0x3f   :  { %1550 = vmatpush3.msra.mxu1 %v2105_v48  ;;  %1594 = vmatprep.subr.mxu0 %v2158_v55 }
  0x40   :  { %1551 = vmatprep.subr.mxu1 %v2123_v50  ;;  %1595 = vmatpush3.msra.mxu0 %v2158_v55 }
  0x41   :  { %1552 = vmatpush3.msra.mxu1 %v2123_v50  ;;  %1596 = vmatprep.subr.mxu0 %v2172_v57 }
  0x42   :  { %1553 = vmatprep.subr.mxu1 %v2137_v52  ;;  %1597 = vmatpush3.msra.mxu0 %v2172_v57 }
  0x43   :  { %1554 = vmatpush3.msra.mxu1 %v2137_v52  ;;  %1598 = vmatprep.subr.mxu0 %v2186_v59 }
  0x44   :  { %1555 = vmatprep.subr.mxu1 %v2151_v54  ;;  %1599 = vmatpush3.msra.mxu0 %v2186_v59 }
  0x45   :  { %1556 = vmatpush3.msra.mxu1 %v2151_v54  ;;  %1638 = vmatprep.subr.mxu0 %v1861_v0 }
  0x46   :  { %1557 = vmatprep.subr.mxu1 %v2165_v56 }
  0x47   :  { %1558 = vmatpush3.msra.mxu1 %v2165_v56 }
  0x48   :  { %1559 = vmatprep.subr.mxu1 %v2179_v58 }
  0x49   :  { %1560 = vmatpush3.msra.mxu1 %v2179_v58 }
  0x4a   :  { %1561 = vmatprep.subr.mxu1 %v2193_v60 }
  0x4b   :  { %1562 = vmatpush3.msra.mxu1 %v2193_v60 }
  0x4c   :  { %1563 = vmatprep.subr.mxu1 %v2202_v61 }
  0x4d   :  { %1564 = vmatpush3.msra.mxu1 %v2202_v61 }
  0x4e   :  { %1603 = vmatprep.subr.mxu1 %v2209_v62 }
  0xde   :  { %v1494_v63 = vpop.f32.mrf.mxu1 }
  0xe0   :  { %v128_v3 = vpop.f32.mrf.mxu1 }
  0xe3   :  { %v1532_v20 = vpop.f32.mrf.mxu0 }
  0xe5   :  { %v301_v55 = vpop.f32.mrf.mxu0 }
  0xee   :  { %v1513_v16 = vpop.f32.mrf.mxu1 }
  0xef   :  { %v215_v22 = vadd.f32 %v1513_v16, %v1494_v63  ;;  %v1262_v63 = vld [vmem:[%s2528_s0 + $0x11] sm:$0xff] }
  0xf0   :  { %v209_v32 = vpop.f32.mrf.mxu1 }
  0xf1   :  { %v311_v59 = vadd.f32 %v1532_v20, %v215_v22  ;;  %v210_v57 = vadd.f32 %v209_v32, %v128_v3 }
  0xf3   :  { %v320_v53 = vadd.f32 %v2215_v24, %v311_v59  ;;  %v310_v51 = vadd.f32 %v301_v55, %v210_v57  ;;  %v2245_v55 = vld [vmem:[%s2531_s3 + $0x168] sm:$0xff]  ;;  %v2310_v57 = vld [vmem:[%s2531_s3 + $0x130] sm:$0xff] }
  0xf4   :  { %v1260_v59 = vld [vmem:[%s2528_s0 + $0x10] sm:$0xff] }
  0xf5   :  { %v2218_v49 = vmax.f32 %v320_v53, 0.0  ;;  %v319_v47 = vadd.f32 %v2215_v24, %v310_v51 }
  0xf7   :  { %v321_v61 = vmax.f32 %v319_v47, 0.0  ;;  %v360_v45 = vrot.slane %v2218_v49, 1  ;;  %v2233_v47 = vld [vmem:[%s2531_s3 + $0x170] sm:$0xff]  ;;  %v533_v51 = vrot.slane %v2218_v49, 2 }
  0xf9   :  { %1600 = vmatprep.mubr.f32.mxu0 %v321_v61  ;;  %v359_v16 = vrot.slane %v321_v61, 1  ;;  %v532_v3 = vrot.slane %v321_v61, 2 }
  0xfa   :  { %1601 = vmatmul.mubr.f32.vlgmr.msra.gmra.mxu0 %v2218_v49 }
  0xfb   :  { %1639 = vmatpush3.msra.mxu0 %v1861_v0  ;;  %v361_v53 = vsel %vm358_vm1, %v359_v16, %v360_v45  ;;  %1654 = vmatprep.mubr.msk.f32.mxu0 %vm55_vm0, %v1262_v63  ;;  %v534_v0 = vsel %vm531_vm2, %v532_v3, %v533_v51 }
  0xfc   :  { %1640 = vmatprep.subr.mxu0 %v1863_v1  ;;  %1565 = vmatprep.mubr.f32.mxu1 %v361_v53 }
  0xfd   :  { %1641 = vmatpush3.msra.mxu0 %v1863_v1  ;;  %1566 = vmatmul.mubr.f32.vlgmr.msra.gmra.mxu1 %v360_v45  ;;  %v2253_v1 = vld [vmem:[%s2531_s3 + $0x160] sm:$0xff]  ;;  %v2262_v45 = vld [vmem:[%s2531_s3 + $0x158] sm:$0xff] }
  0xfe   :  { %1604 = vmatpush3.msra.mxu1 %v2209_v62  ;;  %1642 = vmatprep.subr.mxu0 %v1867_v2 }
  0xff   :  { %1605 = vmatprep.subr.mxu1 %v2233_v47  ;;  %1635 = vmatprep.mubr.f32.mxu1 %v534_v0 }
 0x100   :  { %1643 = vmatpush3.msra.mxu0 %v1867_v2  ;;  %1606 = vmatpush3.msra.mxu1 %v2233_v47  ;;  %v2271_v2 = vld [vmem:[%s2531_s3 + $0x150] sm:$0xff] }
 0x101   :  { %1644 = vmatprep.subr.mxu0 %v1877_v5  ;;  %1607 = vmatprep.subr.mxu1 %v2245_v55 }
 0x102   :  { %1645 = vmatpush3.msra.mxu0 %v1877_v5  ;;  %1608 = vmatpush3.msra.mxu1 %v2245_v55  ;;  %v2280_v5 = vld [vmem:[%s2531_s3 + $0x148] sm:$0xff] }
 0x103   :  { %1646 = vmatprep.subr.mxu0 %v1887_v8  ;;  %1609 = vmatprep.subr.mxu1 %v2253_v1 }
 0x104   :  { %1647 = vmatpush3.msra.mxu0 %v1887_v8  ;;  %1610 = vmatpush3.msra.mxu1 %v2253_v1  ;;  %v2289_v8 = vld [vmem:[%s2531_s3 + $0x140] sm:$0xff] }
 0x105   :  { %1648 = vmatprep.subr.mxu0 %v1895_v10  ;;  %1611 = vmatprep.subr.mxu1 %v2262_v45 }
 0x106   :  { %1649 = vmatpush3.msra.mxu0 %v1895_v10  ;;  %1612 = vmatpush3.msra.mxu1 %v2262_v45  ;;  %v1263_v10 = vld [vmem:[%s2528_s0 + $0x19] sm:$0x3f] }
 0x107   :  { %1650 = vmatprep.subr.mxu0 %v1903_v12  ;;  %1613 = vmatprep.subr.mxu1 %v2271_v2 }
 0x108   :  { %1651 = vmatpush3.msra.mxu0 %v1903_v12  ;;  %1614 = vmatpush3.msra.mxu1 %v2271_v2  ;;  %v2301_v12 = vld [vmem:[%s2531_s3 + $0x138] sm:$0xff] }
 0x109   :  { %1652 = vmatprep.subr.mxu0 %v1911_v14  ;;  %1615 = vmatprep.subr.mxu1 %v2280_v5 }
 0x10a   :  { %1653 = vmatpush3.msra.mxu0 %v1911_v14  ;;  %1616 = vmatpush3.msra.mxu1 %v2280_v5  ;;  %v2319_v14 = vld [vmem:[%s2531_s3 + $0x128] sm:$0xff] }
 0x10b   :  { %1657 = vmatprep.subr.mxu0 %v1922_v17  ;;  %1617 = vmatprep.subr.mxu1 %v2289_v8 }
 0x10c   :  { %1655 = vmatmul.mubr.msk.f32.vlgmr.msra.gmra.mxu0 %vm55_vm0, %v1263_v10  ;;  %1618 = vmatpush3.msra.mxu1 %v2289_v8 }
 0x10d   :  { %1658 = vmatpush3.msra.mxu0 %v1922_v17  ;;  %1619 = vmatprep.subr.mxu1 %v2301_v12  ;;  %v2328_v17 = vld [vmem:[%s2531_s3 + $0x120] sm:$0xff] }
 0x10e   :  { %1659 = vmatprep.subr.mxu0 %v1928_v18  ;;  %1620 = vmatpush3.msra.mxu1 %v2301_v12 }
 0x10f   :  { %1660 = vmatpush3.msra.mxu0 %v1928_v18  ;;  %1621 = vmatprep.subr.mxu1 %v2310_v57  ;;  %v2337_v18 = vld [vmem:[%s2531_s3 + $0x118] sm:$0xff] }
 0x110   :  { %1661 = vmatprep.subr.mxu0 %v1939_v21  ;;  %1622 = vmatpush3.msra.mxu1 %v2310_v57 }
 0x111   :  { %1662 = vmatpush3.msra.mxu0 %v1939_v21  ;;  %1623 = vmatprep.subr.mxu1 %v2319_v14  ;;  %v2346_v21 = vld [vmem:[%s2531_s3 + $0x110] sm:$0xff] }
 0x112   :  { %1663 = vmatprep.subr.mxu0 %v1948_v23  ;;  %1624 = vmatpush3.msra.mxu1 %v2319_v14 }
 0x113   :  { %1664 = vmatpush3.msra.mxu0 %v1948_v23  ;;  %1625 = vmatprep.subr.mxu1 %v2328_v17  ;;  %v2355_v23 = vld [vmem:[%s2531_s3 + $0x108] sm:$0xff] }
 0x114   :  { %1665 = vmatprep.subr.mxu0 %v1962_v26  ;;  %1626 = vmatpush3.msra.mxu1 %v2328_v17 }
 0x115   :  { %1666 = vmatpush3.msra.mxu0 %v1962_v26  ;;  %1627 = vmatprep.subr.mxu1 %v2337_v18  ;;  %v1261_v26 = vld [vmem:[%s2528_s0 + $0x18] sm:$0x3f] }
 0x116   :  { %1667 = vmatprep.subr.mxu0 %v1973_v28  ;;  %1628 = vmatpush3.msra.mxu1 %v2337_v18 }
 0x117   :  { %1668 = vmatpush3.msra.mxu0 %v1973_v28  ;;  %1629 = vmatprep.subr.mxu1 %v2346_v21  ;;  %v2372_v28 = vld [vmem:[%s2531_s3 + $0x100] sm:$0xff] }
 0x118   :  { %1669 = vmatprep.subr.mxu0 %v1984_v30  ;;  %1630 = vmatpush3.msra.mxu1 %v2346_v21 }
 0x119   :  { %1670 = vmatpush3.msra.mxu0 %v1984_v30  ;;  %1631 = vmatprep.subr.mxu1 %v2355_v23  ;;  %v1268_v30 = vld [vmem:[%s2528_s0 + $0x12] sm:$0xff] }
 0x11a   :  { %1671 = vmatprep.subr.mxu0 %v1990_v31  ;;  %1673 = vmatprep.mubr.msk.f32.mxu0 %vm55_vm0, %v1260_v59 }
 0x11b   :  { %1672 = vmatpush3.msra.mxu0 %v1990_v31  ;;  %1632 = vmatpush3.msra.mxu1 %v2355_v23 }
 0x11c   :  { %1674 = vmatmul.mubr.msk.f32.vlgmr.msra.gmra.mxu0 %vm55_vm0, %v1261_v26  ;;  %1633 = vmatprep.subr.mxu1 %v2372_v28 }
 0x11d   :  { %1634 = vmatpush3.msra.mxu1 %v2372_v28  ;;  %1695 = vmatprep.subr.mxu0 %v2002_v33 }
 0x11e   :  { %1636 = vmatmul.mubr.f32.vlgmr.msra.gmra.mxu1 %v533_v51  ;;  %1676 = vmatprep.subr.mxu1 %v1874_v4 }
 0x11f   :  { %1677 = vmatpush3.msra.mxu1 %v1874_v4  ;;  %1692 = vmatprep.mubr.msk.f32.mxu1 %vm55_vm0, %v1268_v30  ;;  %v1269_v4 = vld [vmem:[%s2528_s0 + $0x1a] sm:$0x3f] }
 0x120   :  { %1678 = vmatprep.subr.mxu1 %v1880_v6  ;;  %1696 = vmatpush3.msra.mxu0 %v2002_v33 }
 0x121   :  { %1679 = vmatpush3.msra.mxu1 %v1880_v6  ;;  %1697 = vmatprep.subr.mxu0 %v2012_v34  ;;  %v2561_v6 = vld [vmem:[#allocation5_spill] sm:$0xff] }
 0x122   :  { %1680 = vmatprep.subr.mxu1 %v1884_v7  ;;  %1698 = vmatpush3.msra.mxu0 %v2012_v34 }
 0x123   :  { %1681 = vmatpush3.msra.mxu1 %v1884_v7  ;;  %1699 = vmatprep.subr.mxu0 %v2025_v36  ;;  %v2562_v7 = vld [vmem:[#allocation13_spill] sm:$0xff] }
 0x124   :  { %1682 = vmatprep.subr.mxu1 %v1892_v9  ;;  %1700 = vmatpush3.msra.mxu0 %v2025_v36 }
 0x125   :  { %1683 = vmatpush3.msra.mxu1 %v1892_v9  ;;  %1701 = vmatprep.subr.mxu0 %v2037_v38  ;;  %v2563_v9 = vld [vmem:[#allocation6_spill] sm:$0xff] }
 0x126   :  { %1684 = vmatprep.subr.mxu1 %v1900_v11  ;;  %1702 = vmatpush3.msra.mxu0 %v2037_v38 }
 0x127   :  { %1685 = vmatpush3.msra.mxu1 %v1900_v11  ;;  %1703 = vmatprep.subr.mxu0 %v2049_v40  ;;  %v2564_v11 = vld [vmem:[#allocation7_spill] sm:$0xff] }
 0x128   :  { %1686 = vmatprep.subr.mxu1 %v1908_v13  ;;  %1704 = vmatpush3.msra.mxu0 %v2049_v40 }
 0x129   :  { %1687 = vmatpush3.msra.mxu1 %v1908_v13  ;;  %1705 = vmatprep.subr.mxu0 %v2063_v42  ;;  %v2565_v13 = vld [vmem:[#allocation8_spill] sm:$0xff] }
 0x12a   :  { %1688 = vmatprep.subr.mxu1 %v1916_v15  ;;  %1706 = vmatpush3.msra.mxu0 %v2063_v42 }
 0x12b   :  { %1689 = vmatpush3.msra.mxu1 %v1916_v15  ;;  %1707 = vmatprep.subr.mxu0 %v2077_v44  ;;  %v2566_v15 = vld [vmem:[#allocation9_spill] sm:$0xff] }
 0x12c   :  { %1690 = vmatprep.subr.mxu1 %v1931_v19  ;;  %1708 = vmatpush3.msra.mxu0 %v2077_v44 }
 0x12d   :  { %1691 = vmatpush3.msra.mxu1 %v1931_v19  ;;  %1709 = vmatprep.subr.mxu0 %v2091_v46  ;;  %v2567_v19 = vld [vmem:[#allocation10_spill] sm:$0xff] }
 0x12e   :  { %1693 = vmatmul.mubr.msk.f32.vlgmr.msra.gmra.mxu1 %vm55_vm0, %v1269_v4  ;;  %1730 = vmatprep.subr.mxu1 %v1959_v25 }
 0x12f   :  { %1731 = vmatpush3.msra.mxu1 %v1959_v25  ;;  %1710 = vmatpush3.msra.mxu0 %v2091_v46  ;;  %v2568_v25 = vld [vmem:[#allocation11_spill] sm:$0xff] }
 0x130   :  { %1732 = vmatprep.subr.mxu1 %v1970_v27  ;;  %1711 = vmatprep.subr.mxu0 %v2105_v48 }
 0x131   :  { %1733 = vmatpush3.msra.mxu1 %v1970_v27  ;;  %1712 = vmatpush3.msra.mxu0 %v2105_v48  ;;  %v2569_v27 = vld [vmem:[#allocation12_spill] sm:$0xff] }
 0x132   :  { %1734 = vmatprep.subr.mxu1 %v1981_v29  ;;  %1713 = vmatprep.subr.mxu0 %v2123_v50 }
 0x133   :  { %1735 = vmatpush3.msra.mxu1 %v1981_v29  ;;  %1714 = vmatpush3.msra.mxu0 %v2123_v50 }
 0x134   :  { %1736 = vmatprep.subr.mxu1 %v2018_v35  ;;  %1715 = vmatprep.subr.mxu0 %v2137_v52 }
 0x135   :  { %1737 = vmatpush3.msra.mxu1 %v2018_v35  ;;  %1716 = vmatpush3.msra.mxu0 %v2137_v52 }
 0x136   :  { %1738 = vmatprep.subr.mxu1 %v2032_v37  ;;  %1717 = vmatprep.subr.mxu0 %v2151_v54 }
 0x137   :  { %1739 = vmatpush3.msra.mxu1 %v2032_v37  ;;  %1718 = vmatpush3.msra.mxu0 %v2151_v54  ;;  %v2475_v37 = vld [vmem:[%s2532_s4] ss:$0 sm:$0xff] }
 0x138   :  { %1740 = vmatprep.subr.mxu1 %v2042_v39  ;;  %1719 = vmatprep.subr.mxu0 %v2165_v56 }
 0x139   :  { %1741 = vmatpush3.msra.mxu1 %v2042_v39  ;;  %1720 = vmatpush3.msra.mxu0 %v2165_v56 }
 0x13a   :  { %1742 = vmatprep.subr.mxu1 %v2056_v41  ;;  %1721 = vmatprep.subr.mxu0 %v2179_v58 }
 0x13b   :  { %1743 = vmatpush3.msra.mxu1 %v2056_v41  ;;  %1722 = vmatpush3.msra.mxu0 %v2179_v58 }
 0x13c   :  { %1744 = vmatprep.subr.mxu1 %v2070_v43  ;;  %1723 = vmatprep.subr.mxu0 %v2193_v60 }
 0x13d   :  { %1745 = vmatpush3.msra.mxu1 %v2070_v43  ;;  %1724 = vmatpush3.msra.mxu0 %v2193_v60 }
 0x13e   :  { %1746 = vmatprep.subr.mxu1 %v2561_v6  ;;  %1725 = vmatprep.subr.mxu0 %v2562_v7 }
 0x13f   :  { %1747 = vmatpush3.msra.mxu1 %v2561_v6  ;;  %1726 = vmatpush3.msra.mxu0 %v2562_v7 }
 0x140   :  { %1748 = vmatprep.subr.mxu1 %v2563_v9  ;;  %1765 = vmatprep.subr.mxu0 %v2209_v62 }
 0x141   :  { %1749 = vmatpush3.msra.mxu1 %v2563_v9 }
 0x142   :  { %1750 = vmatprep.subr.mxu1 %v2564_v11 }
 0x143   :  { %1751 = vmatpush3.msra.mxu1 %v2564_v11 }
 0x144   :  { %1752 = vmatprep.subr.mxu1 %v2565_v13 }
 0x145   :  { %1753 = vmatpush3.msra.mxu1 %v2565_v13 }
 0x146   :  { %1754 = vmatprep.subr.mxu1 %v2566_v15 }
 0x147   :  { %1755 = vmatpush3.msra.mxu1 %v2566_v15 }
 0x148   :  { %1756 = vmatprep.subr.mxu1 %v2567_v19 }
 0x149   :  { %1757 = vmatpush3.msra.mxu1 %v2567_v19 }
 0x14a   :  { %1758 = vmatprep.subr.mxu1 %v2568_v25 }
 0x14b   :  { %1759 = vmatpush3.msra.mxu1 %v2568_v25 }
 0x14c   :  { %1760 = vmatprep.subr.mxu1 %v2569_v27 }
 0x14d   :  { %1761 = vmatpush3.msra.mxu1 %v2569_v27 }
 0x1ba   :  { %v1602_v31 = vpop.f32.mrf.mxu0 }
 0x1bc   :  { %v505_v35 = vpop.f32.mrf.mxu0 }
 0x1bd   :  { %v1567_v29 = vpop.f32.mrf.mxu1 }
 0x1be   :  { %v511_v34 = vadd.f32 %v1602_v31, %v1567_v29 }
 0x1bf   :  { %v430_v33 = vpop.f32.mrf.mxu1 }
 0x1c0   :  { %v506_v38 = vadd.f32 %v505_v35, %v430_v33 }
 0x1cc   :  { %v1656_v40 = vpop.f32.mrf.mxu0 }
 0x1ce   :  { %v720_v48 = vpop.f32.mrf.mxu0 }
 0x1dc   :  { %v1675_v50 = vpop.f32.mrf.mxu0 }
 0x1dd   :  { %v807_v54 = vadd.f32 %v1675_v50, %v1656_v40 }
 0x1de   :  { %v1637_v36 = vpop.f32.mrf.mxu1  ;;  %v801_v52 = vpop.f32.mrf.mxu0 }
 0x1df   :  { %v613_v39 = vadd.f32 %v1637_v36, %v511_v34  ;;  %v802_v58 = vadd.f32 %v801_v52, %v720_v48 }
 0x1e0   :  { %v603_v41 = vpop.f32.mrf.mxu1 }
 0x1e1   :  { %v622_v42 = vadd.f32 %v2475_v37, %v613_v39  ;;  %v612_v43 = vadd.f32 %v603_v41, %v506_v38 }
 0x1e3   :  { %v624_v44 = vmax.f32 %v622_v42, 0.0  ;;  %v621_v46 = vadd.f32 %v2475_v37, %v612_v43 }
 0x1e5   :  { %626 = vst [vmem:[%s2533_s5 + $0x8] sm:$0xf] %v624_v44  ;;  %v623_v49 = vmax.f32 %v621_v46, 0.0 }
 0x1e7   :  { %625 = vst [vmem:[%s2533_s5] sm:$0xff] %v623_v49 }
 0x1ee   :  { %v1694_v56 = vpop.f32.mrf.mxu1 }
 0x1ef   :  { %v902_v60 = vadd.f32 %v1694_v56, %v807_v54 }
 0x1f0   :  { %v892_v61 = vpop.f32.mrf.mxu1 }
 0x1f1   :  { %v911_v20 = vadd.f32 %v2215_v24, %v902_v60  ;;  %v901_v22 = vadd.f32 %v892_v61, %v802_v58 }
 0x1f3   :  { %v913_v32 = vmax.f32 %v911_v20, 0.0  ;;  %v910_v63 = vadd.f32 %v2215_v24, %v901_v22 }
 0x1f5   :  { %v912_v16 = vmax.f32 %v910_v63, 0.0  ;;  %v949_v53 = vrot.slane %v913_v32, 1  ;;  %v1120_v10 = vrot.slane %v913_v32, 2 }
 0x1f7   :  { %1762 = vmatprep.mubr.f32.mxu1 %v912_v16  ;;  %v948_v3 = vrot.slane %v912_v16, 1  ;;  %v1119_v51 = vrot.slane %v912_v16, 2 }
 0x1f8   :  { %1763 = vmatmul.mubr.f32.vlgmr.msra.gmra.mxu1 %v913_v32 }
 0x1f9   :  { %v950_v0 = vsel %vm358_vm1, %v948_v3, %v949_v53  ;;  %v1121_v59 = vsel %vm531_vm2, %v1119_v51, %v1120_v10 }
 0x1fa   :  { %1727 = vmatprep.mubr.f32.mxu0 %v950_v0 }
 0x1fb   :  { %1728 = vmatmul.mubr.f32.vlgmr.msra.gmra.mxu0 %v949_v53 }
 0x1fc   :  { %1766 = vmatpush3.msra.mxu0 %v2209_v62  ;;  %1797 = vmatprep.mubr.f32.mxu0 %v1121_v59 }
 0x1fd   :  { %1767 = vmatprep.subr.mxu0 %v2233_v47 }
 0x1fe   :  { %1768 = vmatpush3.msra.mxu0 %v2233_v47 }
 0x1ff   :  { %1769 = vmatprep.subr.mxu0 %v2245_v55 }
 0x200   :  { %1770 = vmatpush3.msra.mxu0 %v2245_v55 }
 0x201   :  { %1771 = vmatprep.subr.mxu0 %v2253_v1 }
 0x202   :  { %1772 = vmatpush3.msra.mxu0 %v2253_v1 }
 0x203   :  { %1773 = vmatprep.subr.mxu0 %v2262_v45 }
 0x204   :  { %1774 = vmatpush3.msra.mxu0 %v2262_v45 }
 0x205   :  { %1775 = vmatprep.subr.mxu0 %v2271_v2 }
 0x206   :  { %1776 = vmatpush3.msra.mxu0 %v2271_v2 }
 0x207   :  { %1777 = vmatprep.subr.mxu0 %v2280_v5 }
 0x208   :  { %1778 = vmatpush3.msra.mxu0 %v2280_v5 }
 0x209   :  { %1779 = vmatprep.subr.mxu0 %v2289_v8 }
 0x20a   :  { %1780 = vmatpush3.msra.mxu0 %v2289_v8 }
 0x20b   :  { %1781 = vmatprep.subr.mxu0 %v2301_v12 }
 0x20c   :  { %1782 = vmatpush3.msra.mxu0 %v2301_v12 }
 0x20d   :  { %1783 = vmatprep.subr.mxu0 %v2310_v57 }
 0x20e   :  { %1784 = vmatpush3.msra.mxu0 %v2310_v57 }
 0x20f   :  { %1785 = vmatprep.subr.mxu0 %v2319_v14 }
 0x210   :  { %1786 = vmatpush3.msra.mxu0 %v2319_v14 }
 0x211   :  { %1787 = vmatprep.subr.mxu0 %v2328_v17 }
 0x212   :  { %1788 = vmatpush3.msra.mxu0 %v2328_v17 }
 0x213   :  { %1789 = vmatprep.subr.mxu0 %v2337_v18 }
 0x214   :  { %1790 = vmatpush3.msra.mxu0 %v2337_v18 }
 0x215   :  { %1791 = vmatprep.subr.mxu0 %v2346_v21 }
 0x216   :  { %1792 = vmatpush3.msra.mxu0 %v2346_v21 }
 0x217   :  { %1793 = vmatprep.subr.mxu0 %v2355_v23 }
 0x218   :  { %1794 = vmatpush3.msra.mxu0 %v2355_v23 }
 0x219   :  { %1795 = vmatprep.subr.mxu0 %v2372_v28 }
 0x21a   :  { %1796 = vmatpush3.msra.mxu0 %v2372_v28 }
 0x21b   :  { %1798 = vmatmul.mubr.f32.vlgmr.msra.gmra.mxu0 %v1120_v10 }
 0x2b8   :  { %v1764_v24 = vpop.f32.mrf.mxu1 }
 0x2ba   :  { %v1094_v1 = vpop.f32.mrf.mxu1 }
 0x2bb   :  { %v1729_v62 = vpop.f32.mrf.mxu0 }
 0x2bc   :  { %v1100_v55 = vadd.f32 %v1764_v24, %v1729_v62 }
 0x2bd   :  { %v1019_v47 = vpop.f32.mrf.mxu0 }
 0x2be   :  { %v1095_v2 = vadd.f32 %v1094_v1, %v1019_v47 }
 0x2db   :  { %v1799_v45 = vpop.f32.mrf.mxu0 }
 0x2dc   :  { %v1200_v5 = vadd.f32 %v1799_v45, %v1100_v55 }
 0x2dd   :  { %v1190_v8 = vpop.f32.mrf.mxu0 }
 0x2de   :  { %v1209_v12 = vadd.f32 %v2475_v37, %v1200_v5  ;;  %v1199_v57 = vadd.f32 %v1190_v8, %v1095_v2 }
 0x2e0   :  { %v1211_v14 = vmax.f32 %v1209_v12, 0.0  ;;  %v1208_v17 = vadd.f32 %v2475_v37, %v1199_v57 }
 0x2e2   :  { %1307 = vst [vmem:[%s2533_s5 + $0x18] sm:$0xf] %v1211_v14  ;;  %v1210_v18 = vmax.f32 %v1208_v17, 0.0 }
 0x2e4   :  { %1306 = vst [vmem:[%s2533_s5 + $0x10] sm:$0xff] %v1210_v18 }
 0x2e5   :  { %1219 = vsyncpa [#allocation3], 1 }

</bundles_post_ra>
